<compile_context>
chip_gen: v6e
topology: v6e:2x2x1
jax: 0.10.0
libtpu: 0.0.40
codegen_flags: <defaults>
</compile_context>

<pallas_src>
import functools

import jax
import jax.numpy as jnp
import numpy as np
from jax.experimental import pallas as pl
from jax.experimental.pallas import tpu as pltpu

T_STEPS = 8        # module's T
LANE = 128         # TPU lane width
CHUNK_ROWS = 128   # rows per inner chunk: carried state fits in the register file
_MIN_GRID = 8      # aim for >= this many grid steps (pipelining + v7x 2-TC split)


def _chip_budget():
    """(rows_cap, vmem_limit_bytes): safe defaults for v7x, bumped on 128 MiB parts."""
    rows_cap, vmem_limit = 1024, 48 << 20        # v7x: 64 MiB physical VMEM
    try:
        vmem_cap = pltpu.get_tpu_info().vmem_capacity_bytes
        if vmem_cap >= (128 << 20):              # v5e / v6e: 128 MiB physical VMEM
            rows_cap, vmem_limit = 2048, 96 << 20
    except Exception:
        pass
    return rows_cap, vmem_limit


def _pick_block_rows(total_rows, rows_cap):
    """Block row count: multiple of CHUNK_ROWS, <= rows_cap, targeting >= _MIN_GRID
    grid steps.  Tiny inputs use the full extent (always a legal block dim)."""
    if total_rows <= CHUNK_ROWS:
        return total_rows
    target = -(-total_rows // _MIN_GRID)                 # ceil(total_rows / 8)
    r = -(-target // CHUNK_ROWS) * CHUNK_ROWS            # round up to chunk multiple
    return max(CHUNK_ROWS, min(rows_cap, r))


def exp_comp_kernel(x_ref, o_ref, *, T, chunk):
    # x_ref, o_ref: (T+1, R, 128) VMEM blocks.  Each (rows, 128) chunk is a dense
    # lane/sublane tile -> unmasked vld/vst.  Processing chunk-by-chunk keeps the
    # temporal carry (x0 / exp_in / last) resident in vregs for the whole T loop.
    n_chunks = x_ref.shape[1] // chunk

    def process(rows):
        x0 = x_ref[0, rows, :].astype(jnp.float32)
        o_ref[0, rows, :] = jnp.zeros(x0.shape, dtype=o_ref.dtype)   # out[0] = 0
        exp_in = x0
        last = jnp.zeros_like(x0)
        for t in range(T):                    # static unroll; T is small (8)
            inv = 1.0 / float(t + 1)          # constant multiply instead of f32 divide
            exp_in = exp_in + (x_ref[t + 1, rows, :].astype(jnp.float32) - x0) * inv
            now = jnp.maximum(exp_in, 0.0)    # wrapped activation `func` (ReLU)
            o_ref[t + 1, rows, :] = (float(t + 1) * (now - last)).astype(o_ref.dtype)
            last = now

    if n_chunks <= 1:
        process(pl.ds(0, x_ref.shape[1]))
    else:
        @pl.loop(0, n_chunks)
        def _(c):
            process(pl.ds(pl.multiple_of(c * chunk, chunk), chunk))


def exp_comp_neuron_forward(x, T=T_STEPS):
    """x: [(T+1)*B, C, H, W] (NCHW).  Returns same shape/dtype."""
    TB, C, H, W = x.shape
    assert TB % (T + 1) == 0, "leading dim must be (T+1)*B"
    B = TB // (T + 1)
    N = B * C * H * W
    assert N % LANE == 0, "flattened feature size must be a multiple of 128"
    # TODO(synk): non-128-multiple feature sizes need a padded / masked last tile.

    total_rows = N // LANE
    rows_cap, vmem_limit = _chip_budget()
    R = _pick_block_rows(total_rows, rows_cap)
    chunk = min(CHUNK_ROWS, R)
    grid = (pl.cdiv(total_rows, R),)   # cdiv tiling; ragged last block is masked

    # Expand temporal dim; flatten features onto dense (rows, 128) tiles.
    # Row-major flat reshape -> bitcast, no layout copy.
    xt = x.reshape(T + 1, total_rows, LANE)

    out = pl.pallas_call(
        functools.partial(exp_comp_kernel, T=T, chunk=chunk),
        out_shape=jax.ShapeDtypeStruct((T + 1, total_rows, LANE), x.dtype),
        grid_spec=pltpu.PrefetchScalarGridSpec(
            num_scalar_prefetch=0,
            grid=grid,
            in_specs=[pl.BlockSpec((T + 1, R, LANE), lambda i: (0, i, 0))],
            out_specs=pl.BlockSpec((T + 1, R, LANE), lambda i: (0, i, 0)),
        ),
        compiler_params=pltpu.CompilerParams(
            dimension_semantics=("parallel",),
            vmem_limit_bytes=vmem_limit,
        ),
    )(xt)

    # Merge temporal dim back: [(T+1)*B, C, H, W]
    return out.reshape(TB, C, H, W)


def _reference(x, T=T_STEPS):
    TB, C, H, W = x.shape
    B = TB // (T + 1)
    xt = x.reshape(T + 1, B, C, H, W).astype(jnp.float32)
    outs = [jnp.zeros_like(xt[0])]
    exp_in = xt[0]
    last = jnp.zeros_like(xt[0])
    for t in range(T):
        exp_in = exp_in + (xt[t + 1] - xt[0]) / float(t + 1)
        now = jnp.maximum(exp_in, 0.0)
        outs.append(float(t + 1) * (now - last))
        last = now
    return jnp.stack(outs, axis=0).reshape(TB, C, H, W).astype(x.dtype)


if __name__ == "__main__":
    key = jax.random.PRNGKey(0)

    # Small shape matching the module spec (single block path).
    B, C, H, W = 2, 4, 16, 16
    x = jax.random.normal(key, ((T_STEPS + 1) * B, C, H, W), dtype=jnp.float32)
    y = jax.block_until_ready(exp_comp_neuron_forward(x))
    np.testing.assert_allclose(np.asarray(y), np.asarray(_reference(x)),
                               rtol=1e-5, atol=1e-5)

    # Medium shape: exercises multi-block grid, ragged last block, and the
    # in-kernel multi-chunk path (total_rows = 1152 -> R = 256, grid = 5).
    B2, C2, H2, W2 = 2, 18, 64, 64
    x2 = jax.random.normal(jax.random.PRNGKey(1),
                           ((T_STEPS + 1) * B2, C2, H2, W2), dtype=jnp.float32)
    y2 = jax.block_until_ready(exp_comp_neuron_forward(x2))
    np.testing.assert_allclose(np.asarray(y2), np.asarray(_reference(x2)),
                               rtol=1e-5, atol=1e-5)

    print("KERNEL_OK")
</pallas_src>

<mosaic_0001>
module attributes {stable_mosaic.version = 11 : i64} {
  func.func @exp_comp_kernel(%arg0: i32, %arg1: memref<9x16x128xf32, #tpu.memory_space<vmem>>, %arg2: memref<9x16x128xf32, #tpu.memory_space<vmem>>) attributes {dimension_semantics = [#tpu.dimension_semantics<parallel>], iteration_bounds = array<i64: 1>, scalar_prefetch = 0 : i64, scratch_operands = 0 : i64, tpu.core_type = #tpu.core_type<tc>, window_params = [{transform_indices = @transform_0, window_bounds = array<i64: 9, 16, 128>}, {transform_indices = @transform_1, window_bounds = array<i64: 9, 16, 128>}]} {
    %c0 = arith.constant 0 : index
    %c0_0 = arith.constant 0 : index
    %c0_1 = arith.constant 0 : index
    %0 = vector.load %arg1[%c0, %c0_0, %c0_1] : memref<9x16x128xf32, #tpu.memory_space<vmem>>, vector<1x16x128xf32>
    %1 = vector.shape_cast %0 : vector<1x16x128xf32> to vector<16x128xf32>
    %cst = arith.constant 0.000000e+00 : f32
    %2 = vector.broadcast %cst : f32 to vector<16x128xf32>
    %c0_2 = arith.constant 0 : index
    %c0_3 = arith.constant 0 : index
    %c0_4 = arith.constant 0 : index
    %3 = vector.load %arg2[%c0_2, %c0_3, %c0_4] : memref<9x16x128xf32, #tpu.memory_space<vmem>>, vector<1x16x128xf32>
    %4 = vector.shape_cast %3 : vector<1x16x128xf32> to vector<16x128xf32>
    %5 = vector.shape_cast %2 : vector<16x128xf32> to vector<1x16x128xf32>
    tpu.vector_store %arg2[%c0_2, %c0_3, %c0_4], %5 {strides = array<i32>} : memref<9x16x128xf32, #tpu.memory_space<vmem>>, vector<1x16x128xf32>,
    %cst_5 = arith.constant 0.000000e+00 : f32
    %6 = vector.broadcast %cst_5 : f32 to vector<16x128xf32>
    %c1 = arith.constant 1 : index
    %c0_6 = arith.constant 0 : index
    %c0_7 = arith.constant 0 : index
    %7 = vector.load %arg1[%c1, %c0_6, %c0_7] : memref<9x16x128xf32, #tpu.memory_space<vmem>>, vector<1x16x128xf32>
    %8 = vector.shape_cast %7 : vector<1x16x128xf32> to vector<16x128xf32>
    %9 = arith.subf %8, %1 : vector<16x128xf32>
    %cst_8 = arith.constant 1.000000e+00 : f32
    %10 = vector.broadcast %cst_8 : f32 to vector<16x128xf32>
    %11 = arith.mulf %9, %10 : vector<16x128xf32>
    %12 = arith.addf %1, %11 : vector<16x128xf32>
    %cst_9 = arith.constant 0.000000e+00 : f32
    %13 = vector.broadcast %cst_9 : f32 to vector<16x128xf32>
    %14 = arith.maximumf %12, %13 : vector<16x128xf32>
    %15 = arith.subf %14, %6 : vector<16x128xf32>
    %cst_10 = arith.constant 1.000000e+00 : f32
    %16 = vector.broadcast %cst_10 : f32 to vector<16x128xf32>
    %17 = arith.mulf %16, %15 : vector<16x128xf32>
    %c1_11 = arith.constant 1 : index
    %c0_12 = arith.constant 0 : index
    %c0_13 = arith.constant 0 : index
    %18 = vector.load %arg2[%c1_11, %c0_12, %c0_13] : memref<9x16x128xf32, #tpu.memory_space<vmem>>, vector<1x16x128xf32>
    %19 = vector.shape_cast %18 : vector<1x16x128xf32> to vector<16x128xf32>
    %20 = vector.shape_cast %17 : vector<16x128xf32> to vector<1x16x128xf32>
    tpu.vector_store %arg2[%c1_11, %c0_12, %c0_13], %20 {strides = array<i32>} : memref<9x16x128xf32, #tpu.memory_space<vmem>>, vector<1x16x128xf32>,
    %c2 = arith.constant 2 : index
    %c0_14 = arith.constant 0 : index
    %c0_15 = arith.constant 0 : index
    %21 = vector.load %arg1[%c2, %c0_14, %c0_15] : memref<9x16x128xf32, #tpu.memory_space<vmem>>, vector<1x16x128xf32>
    %22 = vector.shape_cast %21 : vector<1x16x128xf32> to vector<16x128xf32>
    %23 = arith.subf %22, %1 : vector<16x128xf32>
    %cst_16 = arith.constant 5.000000e-01 : f32
    %24 = vector.broadcast %cst_16 : f32 to vector<16x128xf32>
    %25 = arith.mulf %23, %24 : vector<16x128xf32>
    %26 = arith.addf %12, %25 : vector<16x128xf32>
    %cst_17 = arith.constant 0.000000e+00 : f32
    %27 = vector.broadcast %cst_17 : f32 to vector<16x128xf32>
    %28 = arith.maximumf %26, %27 : vector<16x128xf32>
    %29 = arith.subf %28, %14 : vector<16x128xf32>
    %cst_18 = arith.constant 2.000000e+00 : f32
    %30 = vector.broadcast %cst_18 : f32 to vector<16x128xf32>
    %31 = arith.mulf %30, %29 : vector<16x128xf32>
    %c2_19 = arith.constant 2 : index
    %c0_20 = arith.constant 0 : index
    %c0_21 = arith.constant 0 : index
    %32 = vector.load %arg2[%c2_19, %c0_20, %c0_21] : memref<9x16x128xf32, #tpu.memory_space<vmem>>, vector<1x16x128xf32>
    %33 = vector.shape_cast %32 : vector<1x16x128xf32> to vector<16x128xf32>
    %34 = vector.shape_cast %31 : vector<16x128xf32> to vector<1x16x128xf32>
    tpu.vector_store %arg2[%c2_19, %c0_20, %c0_21], %34 {strides = array<i32>} : memref<9x16x128xf32, #tpu.memory_space<vmem>>, vector<1x16x128xf32>,
    %c3 = arith.constant 3 : index
    %c0_22 = arith.constant 0 : index
    %c0_23 = arith.constant 0 : index
    %35 = vector.load %arg1[%c3, %c0_22, %c0_23] : memref<9x16x128xf32, #tpu.memory_space<vmem>>, vector<1x16x128xf32>
    %36 = vector.shape_cast %35 : vector<1x16x128xf32> to vector<16x128xf32>
    %37 = arith.subf %36, %1 : vector<16x128xf32>
    %cst_24 = arith.constant 0.333333343 : f32
    %38 = vector.broadcast %cst_24 : f32 to vector<16x128xf32>
    %39 = arith.mulf %37, %38 : vector<16x128xf32>
    %40 = arith.addf %26, %39 : vector<16x128xf32>
    %cst_25 = arith.constant 0.000000e+00 : f32
    %41 = vector.broadcast %cst_25 : f32 to vector<16x128xf32>
    %42 = arith.maximumf %40, %41 : vector<16x128xf32>
    %43 = arith.subf %42, %28 : vector<16x128xf32>
    %cst_26 = arith.constant 3.000000e+00 : f32
    %44 = vector.broadcast %cst_26 : f32 to vector<16x128xf32>
    %45 = arith.mulf %44, %43 : vector<16x128xf32>
    %c3_27 = arith.constant 3 : index
    %c0_28 = arith.constant 0 : index
    %c0_29 = arith.constant 0 : index
    %46 = vector.load %arg2[%c3_27, %c0_28, %c0_29] : memref<9x16x128xf32, #tpu.memory_space<vmem>>, vector<1x16x128xf32>
    %47 = vector.shape_cast %46 : vector<1x16x128xf32> to vector<16x128xf32>
    %48 = vector.shape_cast %45 : vector<16x128xf32> to vector<1x16x128xf32>
    tpu.vector_store %arg2[%c3_27, %c0_28, %c0_29], %48 {strides = array<i32>} : memref<9x16x128xf32, #tpu.memory_space<vmem>>, vector<1x16x128xf32>,
    %c4 = arith.constant 4 : index
    %c0_30 = arith.constant 0 : index
    %c0_31 = arith.constant 0 : index
    %49 = vector.load %arg1[%c4, %c0_30, %c0_31] : memref<9x16x128xf32, #tpu.memory_space<vmem>>, vector<1x16x128xf32>
    %50 = vector.shape_cast %49 : vector<1x16x128xf32> to vector<16x128xf32>
    %51 = arith.subf %50, %1 : vector<16x128xf32>
    %cst_32 = arith.constant 2.500000e-01 : f32
    %52 = vector.broadcast %cst_32 : f32 to vector<16x128xf32>
    %53 = arith.mulf %51, %52 : vector<16x128xf32>
    %54 = arith.addf %40, %53 : vector<16x128xf32>
    %cst_33 = arith.constant 0.000000e+00 : f32
    %55 = vector.broadcast %cst_33 : f32 to vector<16x128xf32>
    %56 = arith.maximumf %54, %55 : vector<16x128xf32>
    %57 = arith.subf %56, %42 : vector<16x128xf32>
    %cst_34 = arith.constant 4.000000e+00 : f32
    %58 = vector.broadcast %cst_34 : f32 to vector<16x128xf32>
    %59 = arith.mulf %58, %57 : vector<16x128xf32>
    %c4_35 = arith.constant 4 : index
    %c0_36 = arith.constant 0 : index
    %c0_37 = arith.constant 0 : index
    %60 = vector.load %arg2[%c4_35, %c0_36, %c0_37] : memref<9x16x128xf32, #tpu.memory_space<vmem>>, vector<1x16x128xf32>
    %61 = vector.shape_cast %60 : vector<1x16x128xf32> to vector<16x128xf32>
    %62 = vector.shape_cast %59 : vector<16x128xf32> to vector<1x16x128xf32>
    tpu.vector_store %arg2[%c4_35, %c0_36, %c0_37], %62 {strides = array<i32>} : memref<9x16x128xf32, #tpu.memory_space<vmem>>, vector<1x16x128xf32>,
    %c5 = arith.constant 5 : index
    %c0_38 = arith.constant 0 : index
    %c0_39 = arith.constant 0 : index
    %63 = vector.load %arg1[%c5, %c0_38, %c0_39] : memref<9x16x128xf32, #tpu.memory_space<vmem>>, vector<1x16x128xf32>
    %64 = vector.shape_cast %63 : vector<1x16x128xf32> to vector<16x128xf32>
    %65 = arith.subf %64, %1 : vector<16x128xf32>
    %cst_40 = arith.constant 2.000000e-01 : f32
    %66 = vector.broadcast %cst_40 : f32 to vector<16x128xf32>
    %67 = arith.mulf %65, %66 : vector<16x128xf32>
    %68 = arith.addf %54, %67 : vector<16x128xf32>
    %cst_41 = arith.constant 0.000000e+00 : f32
    %69 = vector.broadcast %cst_41 : f32 to vector<16x128xf32>
    %70 = arith.maximumf %68, %69 : vector<16x128xf32>
    %71 = arith.subf %70, %56 : vector<16x128xf32>
    %cst_42 = arith.constant 5.000000e+00 : f32
    %72 = vector.broadcast %cst_42 : f32 to vector<16x128xf32>
    %73 = arith.mulf %72, %71 : vector<16x128xf32>
    %c5_43 = arith.constant 5 : index
    %c0_44 = arith.constant 0 : index
    %c0_45 = arith.constant 0 : index
    %74 = vector.load %arg2[%c5_43, %c0_44, %c0_45] : memref<9x16x128xf32, #tpu.memory_space<vmem>>, vector<1x16x128xf32>
    %75 = vector.shape_cast %74 : vector<1x16x128xf32> to vector<16x128xf32>
    %76 = vector.shape_cast %73 : vector<16x128xf32> to vector<1x16x128xf32>
    tpu.vector_store %arg2[%c5_43, %c0_44, %c0_45], %76 {strides = array<i32>} : memref<9x16x128xf32, #tpu.memory_space<vmem>>, vector<1x16x128xf32>,
    %c6 = arith.constant 6 : index
    %c0_46 = arith.constant 0 : index
    %c0_47 = arith.constant 0 : index
    %77 = vector.load %arg1[%c6, %c0_46, %c0_47] : memref<9x16x128xf32, #tpu.memory_space<vmem>>, vector<1x16x128xf32>
    %78 = vector.shape_cast %77 : vector<1x16x128xf32> to vector<16x128xf32>
    %79 = arith.subf %78, %1 : vector<16x128xf32>
    %cst_48 = arith.constant 0.166666672 : f32
    %80 = vector.broadcast %cst_48 : f32 to vector<16x128xf32>
    %81 = arith.mulf %79, %80 : vector<16x128xf32>
    %82 = arith.addf %68, %81 : vector<16x128xf32>
    %cst_49 = arith.constant 0.000000e+00 : f32
    %83 = vector.broadcast %cst_49 : f32 to vector<16x128xf32>
    %84 = arith.maximumf %82, %83 : vector<16x128xf32>
    %85 = arith.subf %84, %70 : vector<16x128xf32>
    %cst_50 = arith.constant 6.000000e+00 : f32
    %86 = vector.broadcast %cst_50 : f32 to vector<16x128xf32>
    %87 = arith.mulf %86, %85 : vector<16x128xf32>
    %c6_51 = arith.constant 6 : index
    %c0_52 = arith.constant 0 : index
    %c0_53 = arith.constant 0 : index
    %88 = vector.load %arg2[%c6_51, %c0_52, %c0_53] : memref<9x16x128xf32, #tpu.memory_space<vmem>>, vector<1x16x128xf32>
    %89 = vector.shape_cast %88 : vector<1x16x128xf32> to vector<16x128xf32>
    %90 = vector.shape_cast %87 : vector<16x128xf32> to vector<1x16x128xf32>
    tpu.vector_store %arg2[%c6_51, %c0_52, %c0_53], %90 {strides = array<i32>} : memref<9x16x128xf32, #tpu.memory_space<vmem>>, vector<1x16x128xf32>,
    %c7 = arith.constant 7 : index
    %c0_54 = arith.constant 0 : index
    %c0_55 = arith.constant 0 : index
    %91 = vector.load %arg1[%c7, %c0_54, %c0_55] : memref<9x16x128xf32, #tpu.memory_space<vmem>>, vector<1x16x128xf32>
    %92 = vector.shape_cast %91 : vector<1x16x128xf32> to vector<16x128xf32>
    %93 = arith.subf %92, %1 : vector<16x128xf32>
    %cst_56 = arith.constant 0.142857149 : f32
    %94 = vector.broadcast %cst_56 : f32 to vector<16x128xf32>
    %95 = arith.mulf %93, %94 : vector<16x128xf32>
    %96 = arith.addf %82, %95 : vector<16x128xf32>
    %cst_57 = arith.constant 0.000000e+00 : f32
    %97 = vector.broadcast %cst_57 : f32 to vector<16x128xf32>
    %98 = arith.maximumf %96, %97 : vector<16x128xf32>
    %99 = arith.subf %98, %84 : vector<16x128xf32>
    %cst_58 = arith.constant 7.000000e+00 : f32
    %100 = vector.broadcast %cst_58 : f32 to vector<16x128xf32>
    %101 = arith.mulf %100, %99 : vector<16x128xf32>
    %c7_59 = arith.constant 7 : index
    %c0_60 = arith.constant 0 : index
    %c0_61 = arith.constant 0 : index
    %102 = vector.load %arg2[%c7_59, %c0_60, %c0_61] : memref<9x16x128xf32, #tpu.memory_space<vmem>>, vector<1x16x128xf32>
    %103 = vector.shape_cast %102 : vector<1x16x128xf32> to vector<16x128xf32>
    %104 = vector.shape_cast %101 : vector<16x128xf32> to vector<1x16x128xf32>
    tpu.vector_store %arg2[%c7_59, %c0_60, %c0_61], %104 {strides = array<i32>} : memref<9x16x128xf32, #tpu.memory_space<vmem>>, vector<1x16x128xf32>,
    %c8 = arith.constant 8 : index
    %c0_62 = arith.constant 0 : index
    %c0_63 = arith.constant 0 : index
    %105 = vector.load %arg1[%c8, %c0_62, %c0_63] : memref<9x16x128xf32, #tpu.memory_space<vmem>>, vector<1x16x128xf32>
    %106 = vector.shape_cast %105 : vector<1x16x128xf32> to vector<16x128xf32>
    %107 = arith.subf %106, %1 : vector<16x128xf32>
    %cst_64 = arith.constant 1.250000e-01 : f32
    %108 = vector.broadcast %cst_64 : f32 to vector<16x128xf32>
    %109 = arith.mulf %107, %108 : vector<16x128xf32>
    %110 = arith.addf %96, %109 : vector<16x128xf32>
    %cst_65 = arith.constant 0.000000e+00 : f32
    %111 = vector.broadcast %cst_65 : f32 to vector<16x128xf32>
    %112 = arith.maximumf %110, %111 : vector<16x128xf32>
    %113 = arith.subf %112, %98 : vector<16x128xf32>
    %cst_66 = arith.constant 8.000000e+00 : f32
    %114 = vector.broadcast %cst_66 : f32 to vector<16x128xf32>
    %115 = arith.mulf %114, %113 : vector<16x128xf32>
    %c8_67 = arith.constant 8 : index
    %c0_68 = arith.constant 0 : index
    %c0_69 = arith.constant 0 : index
    %116 = vector.load %arg2[%c8_67, %c0_68, %c0_69] : memref<9x16x128xf32, #tpu.memory_space<vmem>>, vector<1x16x128xf32>
    %117 = vector.shape_cast %116 : vector<1x16x128xf32> to vector<16x128xf32>
    %118 = vector.shape_cast %115 : vector<16x128xf32> to vector<1x16x128xf32>
    tpu.vector_store %arg2[%c8_67, %c0_68, %c0_69], %118 {strides = array<i32>} : memref<9x16x128xf32, #tpu.memory_space<vmem>>, vector<1x16x128xf32>,
    return
  }
  func.func @transform_0(%arg0: i32) -> (i32, i32, i32) {
    %c0_i32 = arith.constant 0 : i32
    %c0_i32_0 = arith.constant 0 : i32
    %c0_i32_1 = arith.constant 0 : i32
    return %c0_i32, %arg0, %c0_i32_0 : i32, i32, i32
  }
  func.func @transform_1(%arg0: i32) -> (i32, i32, i32) {
    %c0_i32 = arith.constant 0 : i32
    %c0_i32_0 = arith.constant 0 : i32
    %c0_i32_1 = arith.constant 0 : i32
    return %c0_i32, %arg0, %c0_i32_0 : i32, i32, i32
  }
}

</mosaic_0001>

<bundles_post_ra>
// kernel: tpu_custom_call.1
= control target key start
LH: loop header
LB: loop body
LE: loop exit
PB: predicated region body
PF: predicated region fallthrough
CT: control target
= control target key end

     0   :  { %6 = vsyncpa [#allocation3], 0  ;;  %s280_s0 = inlined_call_operand.hbm [shape: f32[9,16,128], index: 0, kind: input, shape index: {}]   ;;  %s281_s1 = inlined_call_operand.hbm [shape: f32[9,16,128], index: 1, kind: output, shape index: {}]  }
   0x1   :  { %7 = vsyncpa [#allocation4], 0  ;;  %s231_s6 = smov [#allocation2]  }
   0x2   :  { %s13_s7 = sshll.u32 %s231_s6, 4  ;;  %s14_s7 = int_to_ptr.vmem [resolvable:$true] %s13_s7 }
   0x3   :  { %s195_s8 = scalar_lea.vmem %s14_s7, 2304  ;;  %p200_p1 = scmp.lt.s32.totalorder %s14_s7, %s14_s7 }
   0x4   :  { %p196_p0 = scmp.ne.s32.totalorder %s14_s7, %s195_s8  ;;  %p201_p2 = scmp.lt.s32.totalorder %s195_s8, %s195_s8 }
   0x6   :  { %p202_p3 = por %p201_p2, %p200_p1 }
   0x8   :  { %p203_p4 = pnand %p202_p3, %p196_p0 }
   0xa   :  { %206 = shalt.err (!%p203_p4)
}
   0xb   :  { %s232_s9 = smov 128   ;;  %s233_s10 = smov 8  }
   0xc   :  { %19 = dma.hbm_to_vmem [thread:$0]  %s280_s0, 2304, %s14_s7, [#allocation3], %s232_s9, %s232_s9, %s233_s10  }
   0xd   :  { %227 = dma.done.wait [#allocation3], 2304  }
   0xe   :  { %228 = vsyncadd [#allocation3], 4294964992  ;;  %v234_v0 = vmov 0.0   ;;  %v252_v1 = vld [vmem:[#allocation2] sm:$0xff]  ;;  %v28_v2 = vld [vmem:[#allocation2 + $0x10] sm:$0xff]  ;;  %s235_s0 = smov [#allocation5]  }
   0xf   :  { %25 = vst [vmem:[#allocation5] sm:$0xff] %v234_v0  ;;  %26 = vst [vmem:[#allocation5 + $0x8] sm:$0xff] %v234_v0  ;;  %v40_v3 = vld [vmem:[#allocation2 + $0x20] sm:$0xff]  ;;  %v30_v4 = vsub.f32 %v28_v2, %v252_v1  ;;  %v256_v6 = vld [vmem:[#allocation2 + $0x8] sm:$0xff]  ;;  %s170_s13 = sshll.u32 %s235_s0, 4  ;;  %s171_s13 = int_to_ptr.vmem [resolvable:$true] %s170_s13 }
  0x10   :  { %v42_v5 = vsub.f32 %v40_v3, %v252_v1  ;;  %v29_v7 = vld [vmem:[#allocation2 + $0x18] sm:$0xff]  ;;  %v41_v8 = vld [vmem:[#allocation2 + $0x28] sm:$0xff]  ;;  %v58_v11 = vld [vmem:[#allocation2 + $0x30] sm:$0xff]  ;;  %s207_s14 = scalar_lea.vmem %s171_s13, 2304  ;;  %p212_p6 = scmp.lt.s32.totalorder %s171_s13, %s171_s13 }
  0x11   :  { %v31_v9 = vsub.f32 %v29_v7, %v256_v6  ;;  %v43_v10 = vsub.f32 %v41_v8, %v256_v6  ;;  %v59_v12 = vld [vmem:[#allocation2 + $0x38] sm:$0xff]  ;;  %v76_v13 = vld [vmem:[#allocation2 + $0x40] sm:$0xff]  ;;  %v32_v14 = vadd.f32 %v30_v4, %v252_v1  ;;  %v60_v16 = vsub.f32 %v58_v11, %v252_v1  ;;  %v77_v18 = vld [vmem:[#allocation2 + $0x48] sm:$0xff]  ;;  %p208_p5 = scmp.ne.s32.totalorder %s171_s13, %s207_s14  ;;  %p213_p7 = scmp.lt.s32.totalorder %s207_s14, %s207_s14 }
  0x12   :  { %v44_v15 = vmul.f32 0.5, %v42_v5  ;;  %v61_v17 = vsub.f32 %v59_v12, %v256_v6  ;;  %v78_v21 = vsub.f32 %v76_v13, %v252_v1  ;;  %v79_v22 = vsub.f32 %v77_v18, %v256_v6  ;;  %v94_v23 = vld [vmem:[#allocation2 + $0x50] sm:$0xff]  ;;  %v95_v24 = vld [vmem:[#allocation2 + $0x58] sm:$0xff]  ;;  %v112_v25 = vld [vmem:[#allocation2 + $0x60] sm:$0xff] }
  0x13   :  { %v33_v19 = vadd.f32 %v31_v9, %v256_v6  ;;  %v45_v20 = vmul.f32 0.5, %v43_v10  ;;  %v34_v26 = vmax.f32 %v32_v14, 0.0  ;;  %v62_v28 = vmul.f32 0.33333334, %v60_v16  ;;  %v113_v30 = vld [vmem:[#allocation2 + $0x68] sm:$0xff]  ;;  %v130_v59 = vld [vmem:[#allocation2 + $0x70] sm:$0xff]  ;;  %p214_p8 = por %p213_p7, %p212_p6 }
  0x14   :  { %v46_v27 = vadd.f32 %v44_v15, %v32_v14  ;;  %v63_v29 = vmul.f32 0.33333334, %v61_v17  ;;  %v80_v33 = vmul.f32 0.25, %v78_v21  ;;  %v81_v34 = vmul.f32 0.25, %v79_v22  ;;  %v131_v0 = vld [vmem:[#allocation2 + $0x78] sm:$0xff]  ;;  %v148_v7 = vld [vmem:[#allocation2 + $0x80] sm:$0xff] }
  0x15   :  { %v35_v31 = vmax.f32 %v33_v19, 0.0  ;;  %v47_v32 = vadd.f32 %v45_v20, %v33_v19  ;;  %37 = vst [vmem:[#allocation5 + $0x10] sm:$0xff] %v34_v26  ;;  %v96_v37 = vsub.f32 %v94_v23, %v252_v1  ;;  %v97_v38 = vsub.f32 %v95_v24, %v256_v6  ;;  %v149_v12 = vld [vmem:[#allocation2 + $0x88] sm:$0xff]  ;;  %p215_p9 = pnand %p214_p8, %p208_p5 }
  0x16   :  { %v48_v35 = vmax.f32 %v46_v27, 0.0  ;;  %v64_v36 = vadd.f32 %v62_v28, %v46_v27  ;;  %v114_v41 = vsub.f32 %v112_v25, %v252_v1  ;;  %v115_v42 = vsub.f32 %v113_v30, %v256_v6 }
  0x17   :  { %38 = vst [vmem:[#allocation5 + $0x18] sm:$0xff] %v35_v31  ;;  %v49_v39 = vmax.f32 %v47_v32, 0.0  ;;  %v65_v40 = vadd.f32 %v63_v29, %v47_v32  ;;  %v98_v46 = vmul.f32 0.2, %v96_v37  ;;  %v99_v50 = vmul.f32 0.2, %v97_v38 }
  0x18   :  { %v50_v43 = vsub.f32 %v48_v35, %v34_v26  ;;  %v66_v44 = vmax.f32 %v64_v36, 0.0  ;;  %v82_v45 = vadd.f32 %v80_v33, %v64_v36  ;;  %v116_v63 = vmul.f32 0.16666667, %v114_v41 }
  0x19   :  { %v51_v47 = vsub.f32 %v49_v39, %v35_v31  ;;  %v67_v48 = vmax.f32 %v65_v40, 0.0  ;;  %v83_v49 = vadd.f32 %v81_v34, %v65_v40  ;;  %v117_v5 = vmul.f32 0.16666667, %v115_v42 }
  0x1a   :  { %v52_v51 = vmul.f32 2.0, %v50_v43  ;;  %v68_v52 = vsub.f32 %v66_v44, %v48_v35  ;;  %v84_v53 = vmax.f32 %v82_v45, 0.0  ;;  %v100_v54 = vadd.f32 %v98_v46, %v82_v45 }
  0x1b   :  { %v53_v55 = vmul.f32 2.0, %v51_v47  ;;  %v69_v56 = vsub.f32 %v67_v48, %v49_v39  ;;  %v85_v57 = vmax.f32 %v83_v49, 0.0  ;;  %v101_v58 = vadd.f32 %v99_v50, %v83_v49 }
  0x1c   :  { %55 = vst [vmem:[#allocation5 + $0x20] sm:$0xff] %v52_v51  ;;  %v70_v60 = vmul.f32 3.0, %v68_v52  ;;  %v86_v61 = vsub.f32 %v84_v53, %v66_v44  ;;  %v102_v62 = vmax.f32 %v100_v54, 0.0  ;;  %v118_v10 = vadd.f32 %v116_v63, %v100_v54 }
  0x1d   :  { %56 = vst [vmem:[#allocation5 + $0x28] sm:$0xff] %v53_v55  ;;  %v71_v2 = vmul.f32 3.0, %v69_v56  ;;  %v87_v3 = vsub.f32 %v85_v57, %v67_v48  ;;  %v103_v4 = vmax.f32 %v101_v58, 0.0  ;;  %v132_v11 = vsub.f32 %v130_v59, %v252_v1 }
  0x1e   :  { %73 = vst [vmem:[#allocation5 + $0x30] sm:$0xff] %v70_v60  ;;  %v88_v8 = vmul.f32 4.0, %v86_v61  ;;  %v104_v9 = vsub.f32 %v102_v62, %v84_v53  ;;  %v119_v15 = vadd.f32 %v117_v5, %v101_v58  ;;  %v133_v16 = vsub.f32 %v131_v0, %v256_v6 }
  0x1f   :  { %74 = vst [vmem:[#allocation5 + $0x38] sm:$0xff] %v71_v2  ;;  %v89_v13 = vmul.f32 4.0, %v87_v3  ;;  %v105_v14 = vsub.f32 %v103_v4, %v85_v57  ;;  %v120_v18 = vmax.f32 %v118_v10, 0.0  ;;  %v134_v19 = vmul.f32 0.14285715, %v132_v11 }
  0x20   :  { %91 = vst [vmem:[#allocation5 + $0x40] sm:$0xff] %v88_v8  ;;  %v106_v17 = vmul.f32 5.0, %v104_v9  ;;  %v150_v20 = vsub.f32 %v148_v7, %v252_v1  ;;  %v121_v22 = vmax.f32 %v119_v15, 0.0  ;;  %v135_v23 = vmul.f32 0.14285715, %v133_v16 }
  0x21   :  { %92 = vst [vmem:[#allocation5 + $0x48] sm:$0xff] %v89_v13  ;;  %v107_v21 = vmul.f32 5.0, %v105_v14  ;;  %v151_v24 = vsub.f32 %v149_v12, %v256_v6  ;;  %v122_v25 = vsub.f32 %v120_v18, %v102_v62  ;;  %v136_v26 = vadd.f32 %v134_v19, %v118_v10 }
  0x22   :  { %109 = vst [vmem:[#allocation5 + $0x50] sm:$0xff] %v106_v17  ;;  %v152_v27 = vmul.f32 0.125, %v150_v20  ;;  %v123_v28 = vsub.f32 %v121_v22, %v103_v4  ;;  %v137_v29 = vadd.f32 %v135_v23, %v119_v15 }
  0x23   :  { %110 = vst [vmem:[#allocation5 + $0x58] sm:$0xff] %v107_v21  ;;  %v153_v30 = vmul.f32 0.125, %v151_v24  ;;  %v124_v31 = vmul.f32 6.0, %v122_v25  ;;  %v138_v32 = vmax.f32 %v136_v26, 0.0 }
  0x24   :  { %v154_v33 = vadd.f32 %v152_v27, %v136_v26  ;;  %v125_v34 = vmul.f32 6.0, %v123_v28  ;;  %v139_v35 = vmax.f32 %v137_v29, 0.0 }
  0x25   :  { %v155_v1 = vadd.f32 %v153_v30, %v137_v29  ;;  %127 = vst [vmem:[#allocation5 + $0x60] sm:$0xff] %v124_v31  ;;  %v140_v36 = vsub.f32 %v138_v32, %v120_v18 }
  0x26   :  { %v156_v37 = vmax.f32 %v154_v33, 0.0  ;;  %128 = vst [vmem:[#allocation5 + $0x68] sm:$0xff] %v125_v34  ;;  %v141_v38 = vsub.f32 %v139_v35, %v121_v22 }
  0x27   :  { %v157_v6 = vmax.f32 %v155_v1, 0.0  ;;  %v142_v39 = vmul.f32 7.0, %v140_v36 }
  0x28   :  { %v158_v40 = vsub.f32 %v156_v37, %v138_v32  ;;  %v143_v41 = vmul.f32 7.0, %v141_v38 }
  0x29   :  { %v159_v42 = vsub.f32 %v157_v6, %v139_v35  ;;  %145 = vst [vmem:[#allocation5 + $0x70] sm:$0xff] %v142_v39 }
  0x2a   :  { %v160_v43 = vmul.f32 8.0, %v158_v40  ;;  %146 = vst [vmem:[#allocation5 + $0x78] sm:$0xff] %v143_v41 }
  0x2b   :  { %v161_v44 = vmul.f32 8.0, %v159_v42 }
  0x2c   :  { %163 = vst [vmem:[#allocation5 + $0x80] sm:$0xff] %v160_v43 }
  0x2d   :  { %164 = vst [vmem:[#allocation5 + $0x88] sm:$0xff] %v161_v44 }
  0x2e   :  { %218 = shalt.err (!%p215_p9)
}
  0x2f   :  { %176 = dma.vmem_to_hbm [thread:$0]  %s171_s13, 2304, %s281_s1, [#allocation4], %s232_s9, %s232_s9, %s233_s10  }
  0x30   :  { %229 = dma.done.wait [#allocation4], 2304  }
  0x31   :  { %230 = vsyncadd [#allocation4], 4294964992 }
  0x32   :  { %180 = vsyncpa [#allocation3], 1 }
  0x33   :  { %181 = vsyncpa [#allocation4], 1 }

</bundles_post_ra>
